<compile_context>
chip_gen: v7x
topology: tpu7x:2x2x1
jax: 0.10.0
libtpu: 0.0.40
codegen_flags: <defaults>
</compile_context>

<pallas_src>
import functools
import math

import jax
import jax.numpy as jnp
from jax import lax
from jax.experimental import pallas as pl
from jax.experimental.pallas import tpu as pltpu


def _arcface_kernel(emb_ref, w_ref, gt_ref, out_ref, emb_n_ref, *, s, m, tile_c):
    """Computes one (TILE_B, TILE_C) tile of the ArcFace logits."""
    j = pl.program_id(1)  # class-tile index (inner grid axis)

    # Hoisted embedding normalization: only depends on the B tile, so compute
    # it once per B tile (first class tile) into a VMEM scratch that persists
    # across the class-axis loop.  Stored as bf16, ready for the MXU.
    @pl.when(j == 0)
    def _():
        emb = emb_ref[...].astype(jnp.float32)                        # (TB, E)
        sumsq = jnp.sum(emb * emb, axis=1, keepdims=True)
        # F.normalize(x, dim=1) == x * rsqrt(max(sum(x^2), (1e-12)^2))
        emb_n_ref[...] = (
            emb * lax.rsqrt(jnp.maximum(sumsq, 1e-24))).astype(jnp.bfloat16)

    # Per-class-row normalization (each class tile is visited exactly once).
    w = w_ref[...].astype(jnp.float32)                                # (TC, E)
    w_sumsq = jnp.sum(w * w, axis=1, keepdims=True)
    w_n = (w * lax.rsqrt(jnp.maximum(w_sumsq, 1e-24))).astype(jnp.bfloat16)

    # Cosine similarities on the MXU: contract dim 1 of both operands so the
    # (TC, E) weight tile is consumed as-laid-out (no explicit transpose).
    fc7 = lax.dot_general(
        emb_n_ref[...], w_n,
        dimension_numbers=(((1,), (1,)), ((), ())),
        preferred_element_type=jnp.float32)                           # (TB, TC)

    # Margin correction.  The mask must use the *global* class index.
    col_ids = j * tile_c + lax.broadcasted_iota(jnp.int32, fc7.shape, 1)
    mask = col_ids == gt_ref[...]                                     # (TB, TC)

    # Original target logit for each row (zero if the target class is not in
    # this class tile; in that case mask is all-false and diff is never used).
    target = jnp.sum(jnp.where(mask, fc7, 0.0), axis=1, keepdims=True)  # (TB,1)

    eps = 1e-10
    t_cl = jnp.clip(target, -1.0 + eps, 1.0 - eps)
    # cos(acos(t) + m) == t*cos(m) - sqrt(1 - t^2)*sin(m)   (exact identity)
    marginal = t_cl * math.cos(m) - jnp.sqrt(1.0 - t_cl * t_cl) * math.sin(m)
    diff = marginal - target                                          # (TB, 1)

    out_ref[...] = (fc7 + jnp.where(mask, diff, 0.0)) * s


def _round_up(x, n):
    return (x + n - 1) // n * n


def arcface_forward(embedding, weights, gt, *, s=64.0, m=0.5,
                    tile_b=None, tile_c=None):
    """ArcFace logits.  embedding (B, E), weights (C, E), gt (B,) -> (B, C) f32."""
    B, E = embedding.shape
    C, E2 = weights.shape
    assert E == E2, "embedding size mismatch"

    # Tile sizes: sublane-aligned batch tile, lane-dense (multiple-of-128)
    # class tile.  Defaults stay well inside the 32 MiB scoped-VMEM default on
    # every TPU generation (incl. v7x's 64 MiB VMEM): e.g. for E=512 the
    # working set is ~2*(1024*E*4) + 2*(256*1024*4) + 256*E*6  ≈  7 MiB.
    if tile_b is None:
        tile_b = min(256, _round_up(B, 8))
    if tile_c is None:
        tile_c = min(1024, _round_up(C, 128))
    assert tile_b % 8 == 0 and tile_c % 128 == 0

    B_pad = _round_up(B, tile_b)
    C_pad = _round_up(C, tile_c)

    # Zero padding is benign: zero rows/columns normalize to zero logits, gt
    # never points at a padded class, and padded outputs are sliced off below.
    emb_p = jnp.pad(embedding.astype(jnp.float32), ((0, B_pad - B), (0, 0)))
    w_p = jnp.pad(weights.astype(jnp.float32), ((0, C_pad - C), (0, 0)))
    gt_p = jnp.pad(gt.astype(jnp.int32), (0, B_pad - B)).reshape(B_pad, 1)

    grid = (B_pad // tile_b, C_pad // tile_c)
    kernel = functools.partial(_arcface_kernel, s=s, m=m, tile_c=tile_c)

    out = pl.pallas_call(
        kernel,
        out_shape=jax.ShapeDtypeStruct((B_pad, C_pad), jnp.float32),
        grid_spec=pltpu.PrefetchScalarGridSpec(
            num_scalar_prefetch=0,
            grid=grid,
            in_specs=[
                pl.BlockSpec((tile_b, E), lambda i, j: (i, 0)),   # embedding
                pl.BlockSpec((tile_c, E), lambda i, j: (j, 0)),   # weights
                pl.BlockSpec((tile_b, 1), lambda i, j: (i, 0)),   # labels
            ],
            out_specs=pl.BlockSpec((tile_b, tile_c), lambda i, j: (i, j)),
            scratch_shapes=[pltpu.VMEM((tile_b, E), jnp.bfloat16)],
        ),
        compiler_params=pltpu.CompilerParams(
            # B tiles are independent (megacore-parallel on v7x); the class
            # axis carries the hoisted emb_n scratch, so it stays arbitrary.
            dimension_semantics=("parallel", "arbitrary")),
    )(emb_p, w_p, gt_p)

    return out[:B, :C]


def _arcface_reference(embedding, weights, gt, *, s=64.0, m=0.5,
                       matmul_dtype=jnp.float32):
    """Pure-JAX reference mirroring the PyTorch forward (arccos/cos path)."""
    emb_n = embedding / jnp.maximum(
        jnp.linalg.norm(embedding, axis=1, keepdims=True), 1e-12)
    w_n = weights / jnp.maximum(
        jnp.linalg.norm(weights, axis=1, keepdims=True), 1e-12)
    fc7 = jnp.matmul(emb_n.astype(matmul_dtype), w_n.astype(matmul_dtype).T,
                     preferred_element_type=jnp.float32)
    one_hot = jax.nn.one_hot(gt, weights.shape[0], dtype=fc7.dtype)
    target = jnp.sum(fc7 * one_hot, axis=1)
    eps = 1e-10
    theta = jnp.arccos(jnp.clip(target, -1.0 + eps, 1.0 - eps))
    diff = jnp.cos(theta + m) - target
    return (fc7 + one_hot * diff[:, None]) * s


if __name__ == "__main__":
    s_param, m_param = 64.0, 0.5

    key = jax.random.PRNGKey(0)
    k_emb, k_w, k_gt = jax.random.split(key, 3)

    # Small shapes that still exercise a multi-tile (B, C) grid and C padding.
    B, emb_size, num_classes = 16, 64, 300

    embedding = jax.random.normal(k_emb, (B, emb_size), dtype=jnp.float32)
    # Xavier-uniform init for weights of shape (num_classes, emb_size).
    bound = math.sqrt(6.0 / (emb_size + num_classes))
    weights = jax.random.uniform(k_w, (num_classes, emb_size),
                                 dtype=jnp.float32, minval=-bound, maxval=bound)
    gt = jax.random.randint(k_gt, (B,), 0, num_classes, dtype=jnp.int32)

    # Forced-small tiles -> grid (2, 3) with C padded 300 -> 384 (exercises the
    # global-column-index margin logic and the hoisted emb_n scratch reuse).
    out_tiled = arcface_forward(embedding, weights, gt, s=s_param, m=m_param,
                                tile_b=8, tile_c=128)
    # Default tile selection (single tile per axis at these shapes).
    out_default = arcface_forward(embedding, weights, gt, s=s_param, m=m_param)
    out_tiled, out_default = jax.block_until_ready((out_tiled, out_default))

    assert out_tiled.shape == (B, num_classes)
    assert out_default.shape == (B, num_classes)

    # Tight check vs. a reference using the same bf16 MXU operand dtype.
    ref_bf16 = _arcface_reference(embedding, weights, gt, s=s_param, m=m_param,
                                  matmul_dtype=jnp.bfloat16)
    # Semantic check vs. the exact f32 PyTorch-equivalent reference (tolerance
    # covers the bf16 cast of the MXU operands, scaled by s=64).
    ref_f32 = _arcface_reference(embedding, weights, gt, s=s_param, m=m_param)

    assert jnp.allclose(out_tiled, ref_bf16, rtol=1e-3, atol=3e-2), \
        "mismatch vs bf16 reference (tiled)"
    assert jnp.allclose(out_default, ref_bf16, rtol=1e-3, atol=3e-2), \
        "mismatch vs bf16 reference (default tiles)"
    assert jnp.allclose(out_tiled, ref_f32, rtol=2e-2, atol=0.5), \
        "mismatch vs f32 reference"

    print("KERNEL_OK")
</pallas_src>

<mosaic_0001>
module attributes {stable_mosaic.version = 11 : i64} {
  func.func @_arcface_kernel(%arg0: i32, %arg1: i32, %arg2: memref<8x64xf32, #tpu.memory_space<vmem>>, %arg3: memref<128x64xf32, #tpu.memory_space<vmem>>, %arg4: memref<8x1xi32, #tpu.memory_space<vmem>>, %arg5: memref<8x128xf32, #tpu.memory_space<vmem>>, %arg6: memref<8x64xbf16, #tpu.memory_space<vmem>>) attributes {dimension_semantics = [#tpu.dimension_semantics<parallel>, #tpu.dimension_semantics<arbitrary>], iteration_bounds = array<i64: 2, 3>, scalar_prefetch = 0 : i64, scratch_operands = 1 : i64, tpu.core_type = #tpu.core_type<tc>, window_params = [{transform_indices = @transform_0, window_bounds = array<i64: 8, 64>}, {transform_indices = @transform_1, window_bounds = array<i64: 128, 64>}, {transform_indices = @transform_2, window_bounds = array<i64: 8, 1>}, {transform_indices = @transform_3, window_bounds = array<i64: 8, 128>}]} {
    %c0_i32 = arith.constant 0 : i32
    %0 = arith.cmpi eq, %arg1, %c0_i32 : i32
    %1 = arith.extui %0 : i1 to i32
    %c0_i32_0 = arith.constant 0 : i32
    %2 = arith.cmpi ne, %1, %c0_i32_0 : i32
    scf.if %2 {
      %c0_19 = arith.constant 0 : index
      %c0_20 = arith.constant 0 : index
      %48 = vector.load %arg2[%c0_19, %c0_20] : memref<8x64xf32, #tpu.memory_space<vmem>>, vector<8x64xf32>
      %49 = arith.mulf %48, %48 : vector<8x64xf32>
      %cst_21 = arith.constant dense<0.000000e+00> : vector<8xf32>
      %50 = vector.multi_reduction <add>, %49, %cst_21 [1] : vector<8x64xf32> to vector<8xf32>
      %51 = vector.shape_cast %50 : vector<8xf32> to vector<8x1xf32>
      %cst_22 = arith.constant 1.000000e-24 : f32
      %52 = vector.broadcast %cst_22 : f32 to vector<8x1xf32>
      %53 = arith.maximumf %51, %52 : vector<8x1xf32>
      %54 = math.rsqrt %53 : vector<8x1xf32>
      %55 = vector.broadcast %54 : vector<8x1xf32> to vector<8x64xf32>
      %56 = arith.mulf %48, %55 : vector<8x64xf32>
      %57 = arith.truncf %56 : vector<8x64xf32> to vector<8x64xbf16>
      %c0_23 = arith.constant 0 : index
      %c0_24 = arith.constant 0 : index
      %58 = vector.load %arg6[%c0_23, %c0_24] : memref<8x64xbf16, #tpu.memory_space<vmem>>, vector<8x64xbf16>
      tpu.vector_store %arg6[%c0_23, %c0_24], %57 {strides = array<i32>} : memref<8x64xbf16, #tpu.memory_space<vmem>>, vector<8x64xbf16>,
    } else {
    }
    %c0 = arith.constant 0 : index
    %c0_1 = arith.constant 0 : index
    %3 = vector.load %arg3[%c0, %c0_1] : memref<128x64xf32, #tpu.memory_space<vmem>>, vector<128x64xf32>
    %4 = arith.mulf %3, %3 : vector<128x64xf32>
    %cst = arith.constant dense<0.000000e+00> : vector<128xf32>
    %5 = vector.multi_reduction <add>, %4, %cst [1] : vector<128x64xf32> to vector<128xf32>
    %6 = vector.shape_cast %5 : vector<128xf32> to vector<128x1xf32>
    %cst_2 = arith.constant 1.000000e-24 : f32
    %7 = vector.broadcast %cst_2 : f32 to vector<128x1xf32>
    %8 = arith.maximumf %6, %7 : vector<128x1xf32>
    %9 = math.rsqrt %8 : vector<128x1xf32>
    %10 = vector.broadcast %9 : vector<128x1xf32> to vector<128x64xf32>
    %11 = arith.mulf %3, %10 : vector<128x64xf32>
    %12 = arith.truncf %11 : vector<128x64xf32> to vector<128x64xbf16>
    %c0_3 = arith.constant 0 : index
    %c0_4 = arith.constant 0 : index
    %13 = vector.load %arg6[%c0_3, %c0_4] : memref<8x64xbf16, #tpu.memory_space<vmem>>, vector<8x64xbf16>
    %cst_5 = arith.constant dense<0.000000e+00> : vector<8x128xf32>
    %14 = tpu.matmul %13, %12, %cst_5 {dimension_numbers = #tpu.dot_dimension_numbers<[1], [1], [0], [0], [0, 0, 1, 0], [], []>} : vector<8x64xbf16>, vector<128x64xbf16>, vector<8x128xf32> -> vector<8x128xf32>
    %c128_i32 = arith.constant 128 : i32
    %15 = arith.muli %arg1, %c128_i32 : i32
    %16 = tpu.iota {dimensions = array<i32: 1>} : vector<8x128xi32>
    %17 = vector.broadcast %15 : i32 to vector<8x128xi32>
    %18 = arith.addi %17, %16 : vector<8x128xi32>
    %c0_6 = arith.constant 0 : index
    %c0_7 = arith.constant 0 : index
    %19 = vector.load %arg4[%c0_6, %c0_7] : memref<8x1xi32, #tpu.memory_space<vmem>>, vector<8x1xi32>
    %20 = vector.broadcast %19 : vector<8x1xi32> to vector<8x128xi32>
    %21 = arith.cmpi eq, %18, %20 : vector<8x128xi32>
    %cst_8 = arith.constant 0.000000e+00 : f32
    %22 = vector.broadcast %cst_8 : f32 to vector<8x128xf32>
    %23 = arith.select %21, %14, %22 : vector<8x128xi1>, vector<8x128xf32>
    %cst_9 = arith.constant dense<0.000000e+00> : vector<8xf32>
    %24 = vector.multi_reduction <add>, %23, %cst_9 [1] : vector<8x128xf32> to vector<8xf32>
    %25 = vector.shape_cast %24 : vector<8xf32> to vector<8x1xf32>
    %cst_10 = arith.constant -1.000000e+00 : f32
    %cst_11 = arith.constant 1.000000e+00 : f32
    %26 = vector.broadcast %cst_10 : f32 to vector<8x1xf32>
    %27 = arith.maximumf %26, %25 : vector<8x1xf32>
    %28 = vector.broadcast %cst_11 : f32 to vector<8x1xf32>
    %29 = arith.minimumf %28, %27 : vector<8x1xf32>
    %cst_12 = arith.constant 0.87758255 : f32
    %30 = vector.broadcast %cst_12 : f32 to vector<8x1xf32>
    %31 = arith.mulf %29, %30 : vector<8x1xf32>
    %32 = arith.mulf %29, %29 : vector<8x1xf32>
    %cst_13 = arith.constant 1.000000e+00 : f32
    %33 = vector.broadcast %cst_13 : f32 to vector<8x1xf32>
    %34 = arith.subf %33, %32 : vector<8x1xf32>
    %35 = math.sqrt %34 : vector<8x1xf32>
    %cst_14 = arith.constant 0.47942555 : f32
    %36 = vector.broadcast %cst_14 : f32 to vector<8x1xf32>
    %37 = arith.mulf %35, %36 : vector<8x1xf32>
    %38 = arith.subf %31, %37 : vector<8x1xf32>
    %39 = arith.subf %38, %25 : vector<8x1xf32>
    %cst_15 = arith.constant 0.000000e+00 : f32
    %40 = vector.shape_cast %39 : vector<8x1xf32> to vector<8x1xf32>
    %41 = vector.broadcast %40 : vector<8x1xf32> to vector<8x128xf32>
    %42 = vector.broadcast %cst_15 : f32 to vector<8x128xf32>
    %43 = arith.select %21, %41, %42 : vector<8x128xi1>, vector<8x128xf32>
    %44 = arith.addf %14, %43 : vector<8x128xf32>
    %cst_16 = arith.constant 6.400000e+01 : f32
    %45 = vector.broadcast %cst_16 : f32 to vector<8x128xf32>
    %46 = arith.mulf %44, %45 : vector<8x128xf32>
    %c0_17 = arith.constant 0 : index
    %c0_18 = arith.constant 0 : index
    %47 = vector.load %arg5[%c0_17, %c0_18] : memref<8x128xf32, #tpu.memory_space<vmem>>, vector<8x128xf32>
    tpu.vector_store %arg5[%c0_17, %c0_18], %46 {strides = array<i32>} : memref<8x128xf32, #tpu.memory_space<vmem>>, vector<8x128xf32>,
    return
  }
  func.func @transform_0(%arg0: i32, %arg1: i32) -> (i32, i32) {
    %c0_i32 = arith.constant 0 : i32
    %c0_i32_0 = arith.constant 0 : i32
    return %arg0, %c0_i32 : i32, i32
  }
  func.func @transform_1(%arg0: i32, %arg1: i32) -> (i32, i32) {
    %c0_i32 = arith.constant 0 : i32
    %c0_i32_0 = arith.constant 0 : i32
    return %arg1, %c0_i32 : i32, i32
  }
  func.func @transform_2(%arg0: i32, %arg1: i32) -> (i32, i32) {
    %c0_i32 = arith.constant 0 : i32
    %c0_i32_0 = arith.constant 0 : i32
    return %arg0, %c0_i32 : i32, i32
  }
  func.func @transform_3(%arg0: i32, %arg1: i32) -> (i32, i32) {
    %c0_i32 = arith.constant 0 : i32
    return %arg0, %arg1 : i32, i32
  }
}

</mosaic_0001>

<bundles_post_ra>
// kernel: tpu_custom_call.1
= control target key start
LH: loop header
LB: loop body
LE: loop exit
PB: predicated region body
PF: predicated region fallthrough
CT: control target
= control target key end

     0   :  { %8 = vsyncpa [#allocation4], 0  ;;  %s1156_s0 = inlined_call_operand.vmem [shape: f32[16,64], index: 0, kind: input, shape index: {}]   ;;  %s1157_s1 = inlined_call_operand.vmem [shape: f32[384,64], index: 1, kind: input, shape index: {}]   ;;  %s1158_s2 = inlined_call_operand.vmem [shape: s32[16,1], index: 2, kind: input, shape index: {}]   ;;  %s1159_s3 = inlined_call_operand.hbm [shape: f32[16,384], index: 3, kind: output, shape index: {}]  }
   0x1   :  { %10 = vsyncpa [#allocation4 + $0x1], 0  ;;  %s864_s12 = smov 0   ;;  %s866_s13 = smov 0  }
   0x2   :  { %s868_s14 = smov 0   ;;  %s870_s15 = smov 0  }
   0x3   :  { %s872_s16 = smov 0   ;;  %s874_s17 = smov 0  }
   0x4   :  { %s876_s18 = smov 0   ;;  %s878_s19 = smov 0  }
   0x5 LB: > { %s585_s20 = sadd.s32 4294967295, %s838_s19   ;;  %s586_s21 = sadd.s32 4294967294, %s838_s19   ;;  %s838_s19 = sphi %s878_s19, %s16_s19   ;;  %s834_s18 = sphi %s876_s18, %s1173_s18   ;;  %s830_s17 = sphi %s874_s17, %s1172_s17   ;;  %s826_s16 = sphi %s872_s16, %s1171_s16   ;;  %s822_s15 = sphi %s870_s15, %s1170_s15   ;;  %s818_s14 = sphi %s868_s14, %s1169_s14   ;;  %s814_s13 = sphi %s866_s13, %s1168_s13   ;;  %s810_s12 = sphi %s864_s12, %s1167_s12  }
   0x6   : > { %s25_s22 = sadd.s32 1, %s830_s17  ;;  %s28_s23 = sadd.s32 1, %s834_s18 }
   0x7   : > { %p26_p0 = scmp.ge.s32.totalorder %s25_s22, 3  ;;  %p125_p1 = scmp.ne.s32.totalorder %s818_s14, %s814_s13 }
   0x8   : > { %p126_p2 = scmp.eq.s32.totalorder %s585_s20, 5  ;;  %p131_p5 = scmp.ne.s32.totalorder %s814_s13, %s810_s12 }
   0x9   : > { %s1175_s22 = smov (%p26_p0, %s25_s22), 0  ;;  %s1177_s23 = smov (!%p26_p0, %s28_s23), %s834_s18 }
   0xa   : > { %s111_s24 = ssub.s32 %s830_s17, %s1175_s22  ;;  %p915_p3 = por %p126_p2, %p125_p1 }
   0xb   : > { %p30_p4 = scmp.ge.s32.totalorder %s1177_s23, 2  ;;  %p132_p6 = scmp.eq.s32.totalorder %s586_s21, 5 }
   0xc   : > { %p589_p7 = scmp.ge.s32.totalorder %s838_s19, 1  ;;  %p173_p9 = scmp.lt.s32.totalorder %s838_s19, 7 }
   0xd   : > { %s1179_s23 = smov (%p30_p4, %s1177_s23), 0  ;;  %p924_p8 = por %p132_p6, %p131_p5 }
   0xe   : > { %1163 = sst [smem:[#allocation6_spill]] %s1179_s23  ;;  %s110_s27 = ssub.s32 %s834_s18, %s1179_s23 }
   0xf   : > { %s115_s28 = sadd.s32 1, %s818_s14  ;;  %s112_s29 = sor.u32 %s111_s24, %s110_s27 }
  0x10   : > { %p174_p10 = pnand %p589_p7, %p173_p9  ;;  %p113_p11 = scmp.eq.s32.totalorder %s112_s29, 0 }
  0x11   : > { %s1160_s4 = sand.u32 (!%p174_p10), 1, %s814_s13   ;;  %p205_p12 = scmp.lt.s32.totalorder (!%p174_p10), %s826_s16, 1 }
  0x12   : > { %s933_s30 = scalar_select %p113_p11, %s818_s14, %s115_s28  }
  0x13   : > { %177 = sbr.rel (%p174_p10) target bundleno = 826 (0x33a), region = 32  ;;  %s939_s5 = sshll.u32 (!%p174_p10), %s1160_s4, 3 }
  0x14   : > { %s592_s6 = sshll.u32 (!%p174_p10), %s822_s15, 4  ;;  %s204_s23 = scalar_lea.vmem (!%p174_p10), [#allocation3], %s939_s5 }
  0x15   : > { %p210_p13 = scmp.lt.s32.totalorder (!%p174_p10), %s592_s6, 47  ;;  %p595_p0 = scmp.ne.s32.totalorder (!%p174_p10), %s822_s15, 0 }
  0x1a   : > { %s206_s7 = scalar_select %p205_p12, %s826_s16, 1 }
  0x1b   : > { %s1181_s6 = smov (!%p210_p13, %s592_s6), 47  ;;  %223 = sbr.rel (%p595_p0) target bundleno = 194 (0xc2), region = 36 }
  0x1c   : > { %s591_s8 = sshll.u32 %s206_s7, 3  ;;  %s593_s20 = sshll.u32 %s1181_s6, 3  ;;  %vm226_vm0 = vcmask (!%p595_p0), 523264   ;;  %vm234_vm1 = vcmask (!%p595_p0), 519168  }
  0x1d   : > { %s208_s11 = scalar_lea.vmem %s1156_s0, %s591_s8  ;;  %s949_s27 = scalar_lea.vmem %s1157_s1, %s593_s20 }
  0x1e   : > { %s954_s4 = scalar_lea.vmem %s1158_s2, %s591_s8  ;;  %v224_v0 = vld [vmem:[%s208_s11] sm:$0xff] (!%p595_p0) }
  0x1f   : > { %v225_v1 = vmul.f32 (!%p595_p0), %v224_v0, %v224_v0 }
  0x21   : > { %v227_v2 = vsel (!%p595_p0), %vm226_vm0, %v225_v1, 0.0 }
  0x22   : > { %228 = vadd.xlane.f32.xlu0 %v227_v2 }
  0xaf   : > { %v229_v3 = vpop.xlane.xlu0 %228 }
  0xb0   : > { %v230_v4 = vmax.f32 %v229_v3, 1e-24 }
  0xb2   : > { %707 = vrsqrt.f32 %v230_v4 }
  0xbc   : > { %v708_v5 = vpop.eup %707 }
  0xbd   : > { %v232_v6 = vmul.f32 %v708_v5, %v224_v0 }
  0xbf   : > { %v233_v7 = vpack.c.bf16 %v232_v6, %v232_v6 }
  0xc1   : > { %235 = vst.msk [vmem:[#allocation2] sm:$0xf] %vm234_vm1, %v233_v7 }
  0xc2 PF: > { %v959_v8 = vld [vmem:[%s949_s27] sm:$0xff]  ;;  %vm268_vm2 = vcmask 523264   ;;  %v962_v9 = vld [vmem:[%s949_s27 + $0x10] sm:$0xff]  ;;  %v965_v10 = vld [vmem:[%s949_s27 + $0x8] sm:$0xff]  ;;  %v840_v56 = vmov 0.0   ;;  %vm841_vm3 = vmmov 0  }
  0xc3   : > { %v252_v11 = vmul.f32 %v959_v8, %v959_v8  ;;  %v254_v12 = vmul.f32 %v962_v9, %v962_v9  ;;  %v253_v13 = vmul.f32 %v965_v10, %v965_v10  ;;  %v974_v14 = vld [vmem:[%s949_s27 + $0x18] sm:$0xff]  ;;  %v979_v16 = vld [vmem:[%s949_s27 + $0x28] sm:$0xff]  ;;  %v982_v17 = vld [vmem:[%s949_s27 + $0x20] sm:$0xff]  ;;  %612 = vmatprep.subr.bf16.mxu0 %v840_v56  ;;  %628 = vmatprep.mubr.msk.bf16.mxu0 %vm841_vm3, %v840_v56  ;;  %v842_v58 = vmov 0   ;;  %s632_s6 = smul.u32 3, %s826_s16  ;;  %s489_s9 = sshll.u32 %s204_s23, 4  ;;  %s1101_s9 = int_to_ptr.vmem [resolvable:$true] %s489_s9 }
  0xc4   : > { %v255_v15 = vmul.f32 %v974_v14, %v974_v14  ;;  %v257_v22 = vmul.f32 %v979_v16, %v979_v16  ;;  %v256_v23 = vmul.f32 %v982_v17, %v982_v17  ;;  %v993_v24 = vld [vmem:[%s949_s27 + $0x38] sm:$0xff]  ;;  %v996_v25 = vld [vmem:[%s949_s27 + $0x30] sm:$0xff]  ;;  %v1005_v30 = vld [vmem:[%s949_s27 + $0x48] sm:$0xff]  ;;  %709 = vset.pattern.permute.xlu0 %v842_v58  ;;  %s744_s21 = scalar_lea.vmem %s1101_s9, 128  ;;  %s843_s24 = smov [#allocation3]  }
  0xc5   : > { %v269_v18 = vsel %vm268_vm2, %v252_v11, 0.0  ;;  %v275_v19 = vsel %vm268_vm2, %v254_v12, 0.0  ;;  %v272_v20 = vsel %vm268_vm2, %v253_v13, 0.0  ;;  %v259_v28 = vmul.f32 %v993_v24, %v993_v24  ;;  %v1008_v31 = vld [vmem:[%s949_s27 + $0x40] sm:$0xff]  ;;  %v1017_v36 = vld [vmem:[%s949_s27 + $0x58] sm:$0xff]  ;;  %v1020_v37 = vld [vmem:[%s949_s27 + $0x50] sm:$0xff]  ;;  %s485_s7 = sadd.s32 %s822_s15, %s632_s6  ;;  %p745_p1 = scmp.ne.s32.totalorder %s1101_s9, %s744_s21 }
  0xc6   : > { %270 = vadd.xlane.f32.xlu0 %v269_v18  ;;  %276 = vadd.xlane.f32.xlu1 %v275_v19  ;;  %v278_v21 = vsel %vm268_vm2, %v255_v15, 0.0  ;;  %v284_v26 = vsel %vm268_vm2, %v257_v22, 0.0  ;;  %v281_v27 = vsel %vm268_vm2, %v256_v23, 0.0  ;;  %v258_v29 = vmul.f32 %v996_v25, %v996_v25  ;;  %v1029_v42 = vld [vmem:[%s949_s27 + $0x68] sm:$0xff]  ;;  %v1032_v43 = vld [vmem:[%s949_s27 + $0x60] sm:$0xff]  ;;  %v1041_v48 = vld [vmem:[%s949_s27 + $0x78] sm:$0xff] }
  0xc7   : > { %v290_v32 = vsel %vm268_vm2, %v259_v28, 0.0  ;;  %v261_v34 = vmul.f32 %v1005_v30, %v1005_v30  ;;  %v260_v35 = vmul.f32 %v1008_v31, %v1008_v31  ;;  %v263_v40 = vmul.f32 %v1017_v36, %v1017_v36  ;;  %v1044_v49 = vld [vmem:[%s949_s27 + $0x70] sm:$0xff]  ;;  %v446_v57 = vld [vmem:[%s954_s4] sm:$0xff]  ;;  %s597_s4 = sshll.u32 %s822_s15, 7  ;;  %s600_s8 = sshll.u32 %s485_s7, 7 }
  0xc8   : > { %v287_v33 = vsel %vm268_vm2, %v258_v29, 0.0  ;;  %v262_v41 = vmul.f32 %v1020_v37, %v1020_v37  ;;  %v265_v46 = vmul.f32 %v1029_v42, %v1029_v42  ;;  %v264_v47 = vmul.f32 %v1032_v43, %v1032_v43  ;;  %s1099_s20 = scalar_lea.hbm %s1159_s3, %s600_s8  ;;  %s1165_s15 = sand.u32 1, %s814_s13  }
  0xc9   : > { %v296_v38 = vsel %vm268_vm2, %v261_v34, 0.0  ;;  %v293_v39 = vsel %vm268_vm2, %v260_v35, 0.0  ;;  %v302_v44 = vsel %vm268_vm2, %v263_v40, 0.0  ;;  %v267_v52 = vmul.f32 %v1041_v48, %v1041_v48  ;;  %s474_s16 = scalar_lea.sflag [#allocation4], %s1165_s15  ;;  %p746_p2 = pnand %p745_p1, %p915_p3 }
  0xca   : > { %273 = vadd.xlane.f32.xlu0 %v272_v20  ;;  %279 = vadd.xlane.f32.xlu1 %v278_v21  ;;  %v299_v45 = vsel %vm268_vm2, %v262_v41, 0.0  ;;  %v308_v50 = vsel %vm268_vm2, %v265_v46, 0.0  ;;  %v305_v51 = vsel %vm268_vm2, %v264_v47, 0.0  ;;  %v266_v53 = vmul.f32 %v1044_v49, %v1044_v49  ;;  %s748_s27 = sshll.u32 %s843_s24, 4  ;;  %s749_s27 = int_to_ptr.vmem [resolvable:$false] %s748_s27 }
  0xcb   : > { %v314_v54 = vsel %vm268_vm2, %v267_v52, 0.0  ;;  %p747_p4 = pneg %p746_p2  ;;  %s750_s28 = scalar_lea.vmem %s749_s27, 256 }
  0xcc   : > { %v311_v55 = vsel %vm268_vm2, %v266_v53, 0.0  ;;  %p751_p5 = scmp.lt.s32.totalorder %s1101_s9, %s749_s27  ;;  %p752_p6 = scmp.lt.s32.totalorder %s750_s28, %s744_s21 }
  0xce   : > { %285 = vadd.xlane.f32.xlu1 %v284_v26  ;;  %282 = vadd.xlane.f32.xlu0 %v281_v27  ;;  %p753_p7 = por %p752_p6, %p751_p5 }
  0xd0   : > { %p754_p9 = pnand %p753_p7, %p747_p4 }
  0xd2   : > { %291 = vadd.xlane.f32.xlu1 %v290_v32  ;;  %288 = vadd.xlane.f32.xlu0 %v287_v33 }
  0xd6   : > { %297 = vadd.xlane.f32.xlu1 %v296_v38  ;;  %294 = vadd.xlane.f32.xlu0 %v293_v39 }
  0xda   : > { %303 = vadd.xlane.f32.xlu1 %v302_v44  ;;  %300 = vadd.xlane.f32.xlu0 %v299_v45 }
  0xde   : > { %309 = vadd.xlane.f32.xlu1 %v308_v50  ;;  %306 = vadd.xlane.f32.xlu0 %v305_v51 }
  0xe2   : > { %315 = vadd.xlane.f32.xlu1 %v314_v54  ;;  %312 = vadd.xlane.f32.xlu0 %v311_v55 }
  0xf8   : > { %448 = vperm.xlu0 %709, %v446_v57  }
 0x153   : > { %v271_v59 = vpop.xlane.xlu0 %270  ;;  %v277_v60 = vpop.xlane.xlu1 %276 }
 0x154   : > { %v317_v61 = vmax.f32 %v271_v59, 1e-24  ;;  %v319_v62 = vmax.f32 %v277_v60, 1e-24 }
 0x156   : > { %710 = vrsqrt.f32 %v317_v61 }
 0x157   : > { %v274_v63 = vpop.xlane.xlu0 %273  ;;  %v280_v0 = vpop.xlane.xlu1 %279 }
 0x158   : > { %v318_v1 = vmax.f32 %v274_v63, 1e-24  ;;  %v320_v2 = vmax.f32 %v280_v0, 1e-24 }
 0x15a   : > { %712 = vrsqrt.f32 %v318_v1 }
 0x15b   : > { %714 = vrsqrt.f32 %v319_v62  ;;  %v286_v3 = vpop.xlane.xlu1 %285  ;;  %v283_v4 = vpop.xlane.xlu0 %282 }
 0x15c   : > { %716 = vrsqrt.f32 %v320_v2  ;;  %v322_v5 = vmax.f32 %v286_v3, 1e-24  ;;  %v321_v6 = vmax.f32 %v283_v4, 1e-24 }
 0x15e   : > { %718 = vrsqrt.f32 %v322_v5 }
 0x15f   : > { %720 = vrsqrt.f32 %v321_v6  ;;  %v292_v11 = vpop.xlane.xlu1 %291  ;;  %v289_v12 = vpop.xlane.xlu0 %288 }
 0x160   : > { %v711_v7 = vpop.eup %710  ;;  %v324_v20 = vmax.f32 %v292_v11, 1e-24  ;;  %v323_v22 = vmax.f32 %v289_v12, 1e-24 }
 0x161   : > { %v349_v18 = vmul.f32 %v711_v7, %v959_v8 }
 0x162   : > { %722 = vrsqrt.f32 %v324_v20 }
 0x163   : > { %724 = vrsqrt.f32 %v323_v22  ;;  %v298_v29 = vpop.xlane.xlu1 %297  ;;  %v295_v8 = vpop.xlane.xlu0 %294 }
 0x164   : > { %v713_v13 = vpop.eup %712  ;;  %v326_v34 = vmax.f32 %v298_v29, 1e-24  ;;  %v325_v35 = vmax.f32 %v295_v8, 1e-24 }
 0x165   : > { %v715_v15 = vpop.eup %714  ;;  %v350_v19 = vmul.f32 %v713_v13, %v965_v10 }
 0x166   : > { %v717_v21 = vpop.eup %716  ;;  %v351_v27 = vmul.f32 %v715_v15, %v962_v9  ;;  %726 = vrsqrt.f32 %v326_v34 }
 0x167   : > { %v365_v23 = vpack.c.bf16 %v350_v19, %v349_v18  ;;  %v352_v28 = vmul.f32 %v717_v21, %v974_v14  ;;  %728 = vrsqrt.f32 %v325_v35  ;;  %v304_v9 = vpop.xlane.xlu1 %303  ;;  %v301_v44 = vpop.xlane.xlu0 %300  ;;  %v442_v21 = vlaneseq }
 0x168   : > { %v719_v32 = vpop.eup %718  ;;  %v328_v46 = vmax.f32 %v304_v9, 1e-24  ;;  %v327_v47 = vmax.f32 %v301_v44, 1e-24 }
 0x169   : > { %v378_v26 = vsel %vm268_vm2, %v365_v23, 0  ;;  %v721_v33 = vpop.eup %720  ;;  %v366_v10 = vpack.c.bf16 %v352_v28, %v351_v27  ;;  %v354_v39 = vmul.f32 %v719_v32, %v979_v16  ;;  %v443_v22 = vand.u32 127, %v442_v21 }
 0x16a   : > { %613 = vmatpush3.bf16.xpose.msra.mxu0 %v378_v26  ;;  %v353_v38 = vmul.f32 %v721_v33, %v982_v17  ;;  %730 = vrsqrt.f32 %v328_v46  ;;  %v444_v23 = vstv %s597_s4 }
 0x16b   : > { %614 = vmatprep.subr.bf16.mxu0 %v840_v56  ;;  %v381_v40 = vsel %vm268_vm2, %v366_v10, 0  ;;  %732 = vrsqrt.f32 %v327_v47  ;;  %v310_v51 = vpop.xlane.xlu1 %309  ;;  %v307_v54 = vpop.xlane.xlu0 %306  ;;  %v445_v26 = vadd.s32 %v444_v23, %v443_v22 }
 0x16c   : > { %v723_v14 = vpop.eup %722  ;;  %v367_v41 = vpack.c.bf16 %v354_v39, %v353_v38  ;;  %v330_v57 = vmax.f32 %v310_v51, 1e-24  ;;  %v329_v58 = vmax.f32 %v307_v54, 1e-24 }
 0x16d   : > { %v725_v45 = vpop.eup %724  ;;  %v356_v16 = vmul.f32 %v723_v14, %v993_v24 }
 0x16e   : > { %v384_v50 = vsel %vm268_vm2, %v367_v41, 0  ;;  %v355_v17 = vmul.f32 %v725_v45, %v996_v25  ;;  %734 = vrsqrt.f32 %v330_v57 }
 0x16f   : > { %736 = vrsqrt.f32 %v329_v58  ;;  %v316_v24 = vpop.xlane.xlu1 %315  ;;  %v313_v63 = vpop.xlane.xlu0 %312 }
 0x170   : > { %v727_v52 = vpop.eup %726  ;;  %v368_v53 = vpack.c.bf16 %v356_v16, %v355_v17  ;;  %v332_v1 = vmax.f32 %v316_v24, 1e-24  ;;  %v331_v2 = vmax.f32 %v313_v63, 1e-24 }
 0x171   : > { %v729_v55 = vpop.eup %728  ;;  %v358_v25 = vmul.f32 %v727_v52, %v1005_v30 }
 0x172   : > { %615 = vmatpush3.bf16.xpose.msra.mxu0 %v381_v40  ;;  %v387_v59 = vsel %vm268_vm2, %v368_v53, 0  ;;  %v357_v60 = vmul.f32 %v729_v55, %v1008_v31  ;;  %738 = vrsqrt.f32 %v332_v1 }
 0x173   : > { %616 = vmatprep.subr.bf16.mxu0 %v840_v56  ;;  %740 = vrsqrt.f32 %v331_v2 }
 0x174   : > { %v731_v61 = vpop.eup %730  ;;  %v369_v62 = vpack.c.bf16 %v358_v25, %v357_v60 }
 0x175   : > { %v733_v0 = vpop.eup %732  ;;  %v360_v31 = vmul.f32 %v731_v61, %v1017_v36 }
 0x176   : > { %v390_v3 = vsel %vm268_vm2, %v369_v62, 0  ;;  %v359_v4 = vmul.f32 %v733_v0, %v1020_v37 }
 0x177   : > { %v449_v27 = vpop.permute.xlu0 %448 }
 0x178   : > { %v735_v30 = vpop.eup %734  ;;  %v370_v5 = vpack.c.bf16 %v360_v31, %v359_v4  ;;  %vm450_vm4 = vcmp.eq.s32.totalorder %v445_v26, %v449_v27 }
 0x179   : > { %v737_v6 = vpop.eup %736  ;;  %v362_v12 = vmul.f32 %v735_v30, %v1029_v42  ;;  %v373_v42 = vld [vmem:[#allocation2] sm:$0xf] }
 0x17a   : > { %617 = vmatpush3.bf16.xpose.msra.mxu0 %v384_v50  ;;  %v393_v7 = vsel %vm268_vm2, %v370_v5, 0  ;;  %v361_v11 = vmul.f32 %v737_v6, %v1032_v43 }
 0x17b   : > { %618 = vmatprep.subr.bf16.mxu0 %v840_v56 }
 0x17c   : > { %v739_v13 = vpop.eup %738  ;;  %v371_v36 = vpack.c.bf16 %v362_v12, %v361_v11 }
 0x17d   : > { %v741_v37 = vpop.eup %740  ;;  %v364_v19 = vmul.f32 %v739_v13, %v1041_v48 }
 0x17e   : > { %v396_v15 = vsel %vm268_vm2, %v371_v36, 0  ;;  %v363_v18 = vmul.f32 %v741_v37, %v1044_v49 }
 0x180   : > { %v372_v20 = vpack.c.bf16 %v364_v19, %v363_v18 }
 0x182   : > { %619 = vmatpush3.bf16.xpose.msra.mxu0 %v387_v59  ;;  %v399_v43 = vsel %vm268_vm2, %v372_v20, 0 }
 0x183   : > { %620 = vmatprep.subr.bf16.mxu0 %v840_v56 }
 0x18a   : > { %621 = vmatpush3.bf16.xpose.msra.mxu0 %v390_v3 }
 0x18b   : > { %622 = vmatprep.subr.bf16.mxu0 %v840_v56 }
 0x192   : > { %623 = vmatpush3.bf16.xpose.msra.mxu0 %v393_v7 }
 0x193   : > { %624 = vmatprep.subr.bf16.mxu0 %v840_v56 }
 0x19a   : > { %625 = vmatpush3.bf16.xpose.msra.mxu0 %v396_v15 }
 0x19b   : > { %626 = vmatprep.subr.bf16.mxu0 %v840_v56 }
 0x1a2   : > { %627 = vmatpush3.bf16.xpose.msra.mxu0 %v399_v43 }
 0x1a9   : > { %629 = vmatmul.mubr.msk.bf16.vlgmr.msra.gmra.mrb[0].mxu0 %vm268_vm2, %v373_v42 }
 0x27c   : > { %v435_v49 = vpop.f32.mrb[0].mxu0 }
 0x27d   : > { %v630_v28 = vpop.f32.mrb[1].mxu0  ;;  %v451_v48 = vsel %vm450_vm4, %v435_v49, 0.0 }
 0x27e   : > { %v438_v56 = vpop.f32.mrb[2].mxu0  ;;  %452 = vadd.xlane.f32.xlu1 %v451_v48 }
 0x27f   : > { %v631_v29 = vpop.f32.mrb[3].mxu0 }
 0x30b   : > { %v453_v32 = vpop.xlane.xlu1 %452 }
 0x30c   : > { %v598_v8 = vclamps-f32 %v453_v32, 1.0 }
 0x30e   : > { %v457_v33 = vmul.f32 %v598_v8, %v598_v8  ;;  %v456_v9 = vmul.f32 0.87758255, %v598_v8 }
 0x310   : > { %v458_v10 = vsub.f32 1.0, %v457_v33 }
 0x312   : > { %742 = vrsqrt.f32 %v458_v10  ;;  %vm461_vm5 = vcmp.eq.f32.partialorder %v458_v10, inf  ;;  %v464_v38 = vand.u32 2147483648, %v458_v10  ;;  %vm463_vm6 = vcmp.eq.f32.partialorder %v458_v10, 0.0 }
 0x31c   : > { %v743_v34 = vpop.eup %742 }
 0x31d   : > { %v460_v35 = vmul.f32 %v743_v34, %v458_v10 }
 0x31f   : > { %v462_v39 = vsel %vm461_vm5, %v458_v10, %v460_v35 }
 0x320   : > { %v465_v40 = vsel %vm463_vm6, %v464_v38, %v462_v39 }
 0x321   : > { %v466_v14 = vmul.f32 0.47942555, %v465_v40 }
 0x323   : > { %v467_v41 = vsub.f32 %v456_v9, %v466_v14 }
 0x325   : > { %v468_v44 = vsub.f32 %v467_v41, %v453_v32 }
 0x327   : > { %v469_v45 = vsel %vm450_vm4, %v468_v44, 0.0 }
 0x328   : > { %v470_v46 = vadd.f32 %v469_v45, %v435_v49 }
 0x32a   : > { %v471_v47 = vmul.f32 64.0, %v470_v46 }
 0x32c   : > { %472 = vst [vmem:[%s204_s23] sm:$0xff] %v471_v47 }
 0x32d   : > { %757 = shalt.err (!%p754_p9)
}
 0x32e   : > { %s758_s23 = scalar_lea.hbm %s1099_s20, 128  ;;  %s762_s4 = scalar_lea.hbm %s1159_s3, 768 }
 0x32f   : > { %p759_p10 = scmp.ne.s32.totalorder %s1099_s20, %s758_s23  ;;  %p763_p13 = scmp.lt.u32.totalorder %s1099_s20, %s1159_s3 }
 0x330   : > { %p764_p0 = scmp.lt.u32.totalorder %s762_s4, %s758_s23  ;;  %p766_p2 = scmp.lt.u32.totalorder %s758_s23, %s1099_s20 }
 0x331   : > { %p760_p11 = pnand %p759_p10, %p915_p3 }
 0x332   : > { %p765_p1 = por %p764_p0, %p763_p13 }
 0x333   : > { %p761_p12 = pneg %p760_p11 }
 0x334   : > { %p767_p4 = por %p766_p2, %p765_p1 }
 0x336   : > { %p768_p5 = pnand %p767_p4, %p761_p12 }
 0x338   : > { %771 = shalt.err (!%p768_p5)
}
 0x339   : > { %633 = dma.vmem_to_hbm [thread:$0]  (%p915_p3), %s1101_s9, 128, %s1099_s20, %s474_s16  }
 0x33a PF: > { %p639_p6 = scmp.ge.s32.totalorder %s838_s19, 2  ;;  %s501_s8 = sand.u32 1, %s810_s12  }
 0x33b   : > { %s502_s10 = scalar_lea.sflag [#allocation4], %s501_s8 }
 0x33c   : > { %p636_p7 = pnand %p639_p6, %p924_p8 }
 0x33e   : > { %805 = dma.done.wait (!%p636_p7), %s502_s10, 128  }
 0x33f   : > { %807 = vsyncadd (!%p636_p7), %s502_s10, 4294967168  ;;  %s16_s19 = sadd.s32 1, %s838_s19   ;;  %s1166_s25 = sld [smem:[#allocation6_spill]] }
 0x340   : > { %p13_p9 = scmp.ge.s32.totalorder %s16_s19, 8   ;;  %s1167_s12 = smov %s814_s13 }
 0x341   : > { %s1168_s13 = smov %s818_s14  ;;  %s1169_s14 = smov %s933_s30 }
 0x342   : > { %s1170_s15 = smov %s830_s17  ;;  %s1171_s16 = smov %s834_s18 }
 0x343   : > { %s1172_s17 = smov %s1175_s22  ;;  %15 = sbr.rel (!%p13_p9) target bundleno = 5 (0x5), region = 77 }
 0x345   : > { %s1173_s18 = smov %s1166_s25 }
 0x34a   :  { %507 = vsyncpa [#allocation4], 1 }
 0x34b   :  { %509 = vsyncpa [#allocation4 + $0x1], 1 }

</bundles_post_ra>
